<compile_context>
chip_gen: v6e
topology: v6e:2x2x1
jax: 0.10.0
libtpu: 0.0.40
codegen_flags: <defaults>
</compile_context>

<pallas_src>
import functools

import jax
import jax.numpy as jnp
import numpy as np
from jax.experimental import pallas as pl
from jax.experimental.pallas import tpu as pltpu

IN_FEATURES = 9
HIDDEN = 256
OUT_FEATURES = 9
MAX_BLOCK_M = 512


def qnetwork_kernel(x_ref, w1_ref, b1_ref, w2_ref, b2_ref, w3_ref, b3_ref, o_ref):
    # One batch tile [TM, 9]; all weights/biases are VMEM-resident across the grid.
    x = x_ref[...]                                                     # [TM, 9] f32

    # fc1 + relu  (MXU matmul with f32 accumulation; Mosaic pads the K=9 contraction)
    h1 = jnp.dot(x, w1_ref[...], preferred_element_type=jnp.float32) + b1_ref[...]
    h1 = jnp.maximum(h1, 0.0)                                          # [TM, 256]

    # fc2 + relu
    h2 = jnp.dot(h1, w2_ref[...], preferred_element_type=jnp.float32) + b2_ref[...]
    h2 = jnp.maximum(h2, 0.0)                                          # [TM, 256]

    # fc3 (narrow 9-wide output; masked vst, but ~14x fewer HBM bytes than 128 lanes)
    out = jnp.dot(h2, w3_ref[...], preferred_element_type=jnp.float32) + b3_ref[...]
    o_ref[...] = out.astype(o_ref.dtype)                               # [TM, 9]


def _round_up(x, m):
    return ((x + m - 1) // m) * m


def _pick_block_m(batch, max_block_m):
    """Batch tile: >= whole batch for tiny inputs, otherwise aim for >= 2 tiles
    (v7x megacore) capped at max_block_m; always a multiple of 8 (sublane rule)."""
    if batch <= 16:
        return _round_up(batch, 8)
    return min(max_block_m, _round_up((batch + 1) // 2, 8))


@functools.partial(jax.jit, static_argnames=("max_block_m",))
def qnetwork_forward(x, params, max_block_m=MAX_BLOCK_M):
    """x: [B, 9] float32 board states -> Q-values [B, 9] float32."""
    B = x.shape[0]
    bm = _pick_block_m(B, max_block_m)
    n_tiles = pl.cdiv(B, bm)
    x = x.astype(jnp.float32)

    w1, b1 = params["w1"], params["b1"]
    w2, b2 = params["w2"], params["b2"]
    w3, b3 = params["w3"], params["b3"]

    flops = 2 * B * (IN_FEATURES * HIDDEN + HIDDEN * HIDDEN + HIDDEN * OUT_FEATURES)
    weight_bytes = sum(int(np.prod(v.shape)) * v.dtype.itemsize
                       for v in (w1, b1, w2, b2, w3, b3))
    bytes_accessed = B * IN_FEATURES * 4 + B * OUT_FEATURES * 4 + weight_bytes

    return pl.pallas_call(
        qnetwork_kernel,
        out_shape=jax.ShapeDtypeStruct((B, OUT_FEATURES), jnp.float32),
        grid=(n_tiles,),
        in_specs=[
            pl.BlockSpec((bm, IN_FEATURES), lambda i: (i, 0)),        # x  (pipelined)
            pl.BlockSpec((IN_FEATURES, HIDDEN), lambda i: (0, 0)),    # w1 (resident)
            pl.BlockSpec((1, HIDDEN), lambda i: (0, 0)),              # b1
            pl.BlockSpec((HIDDEN, HIDDEN), lambda i: (0, 0)),         # w2
            pl.BlockSpec((1, HIDDEN), lambda i: (0, 0)),              # b2
            pl.BlockSpec((HIDDEN, OUT_FEATURES), lambda i: (0, 0)),   # w3
            pl.BlockSpec((1, OUT_FEATURES), lambda i: (0, 0)),        # b3
        ],
        out_specs=pl.BlockSpec((bm, OUT_FEATURES), lambda i: (i, 0)),
        compiler_params=pltpu.CompilerParams(
            dimension_semantics=("parallel",),     # batch tiles shard across TCs on v7x
            vmem_limit_bytes=32 * 1024 * 1024,     # headroom; footprint is ~1-2 MiB
        ),
        cost_estimate=pl.CostEstimate(
            flops=flops, transcendentals=0, bytes_accessed=bytes_accessed),
    )(x, w1, b1, w2, b2, w3, b3)


def init_params(key):
    """Deterministic init mimicking torch.nn.Linear's U(-1/sqrt(fan_in), +1/sqrt(fan_in)).

    Weights are stored as [in_features, out_features] (W^T of torch layout), f32."""
    ks = jax.random.split(key, 6)

    def linear(kw, kb, fan_in, fan_out):
        bound = 1.0 / np.sqrt(fan_in)
        w = jax.random.uniform(kw, (fan_in, fan_out), jnp.float32, -bound, bound)
        b = jax.random.uniform(kb, (1, fan_out), jnp.float32, -bound, bound)
        return w, b

    w1, b1 = linear(ks[0], ks[1], IN_FEATURES, HIDDEN)
    w2, b2 = linear(ks[2], ks[3], HIDDEN, HIDDEN)
    w3, b3 = linear(ks[4], ks[5], HIDDEN, OUT_FEATURES)
    return {"w1": w1, "b1": b1, "w2": w2, "b2": b2, "w3": w3, "b3": b3}


def qnetwork_reference(x, p):
    # Pure-f32 reference of the torch forward pass.
    h1 = jnp.maximum(x @ p["w1"] + p["b1"], 0.0)
    h2 = jnp.maximum(h1 @ p["w2"] + p["b2"], 0.0)
    return h2 @ p["w3"] + p["b3"]


# TODO(synk): update_q_values (Adam optimizer step / MSE backward) is training logic,
# not part of the forward pass; only forward() is implemented as a kernel.

if __name__ == "__main__":
    key = jax.random.PRNGKey(0)
    pkey, xkey1, xkey2 = jax.random.split(key, 3)

    params = init_params(pkey)

    # Small batch of flattened 3x3 board states -> single 8-row batch tile.
    x_small = jax.random.uniform(xkey1, (8, IN_FEATURES), jnp.float32, -1.0, 1.0)
    out_small = jax.block_until_ready(qnetwork_forward(x_small, params))
    np.testing.assert_allclose(
        np.asarray(out_small), np.asarray(qnetwork_reference(x_small, params)),
        rtol=2e-2, atol=2e-2)

    # Larger ragged batch: exercises the 2-tile grid and the masked last tile.
    x_big = jax.random.uniform(xkey2, (300, IN_FEATURES), jnp.float32, -1.0, 1.0)
    out_big = jax.block_until_ready(qnetwork_forward(x_big, params))
    np.testing.assert_allclose(
        np.asarray(out_big), np.asarray(qnetwork_reference(x_big, params)),
        rtol=2e-2, atol=2e-2)

    print("KERNEL_OK")
</pallas_src>

<mosaic_0001>
module attributes {stable_mosaic.version = 11 : i64} {
  func.func @qnetwork_kernel(%arg0: i32, %arg1: memref<8x9xf32, #tpu.memory_space<vmem>>, %arg2: memref<9x256xf32, #tpu.memory_space<vmem>>, %arg3: memref<1x256xf32, #tpu.memory_space<vmem>>, %arg4: memref<256x256xf32, #tpu.memory_space<vmem>>, %arg5: memref<1x256xf32, #tpu.memory_space<vmem>>, %arg6: memref<256x9xf32, #tpu.memory_space<vmem>>, %arg7: memref<1x9xf32, #tpu.memory_space<vmem>>, %arg8: memref<8x9xf32, #tpu.memory_space<vmem>>) attributes {dimension_semantics = [#tpu.dimension_semantics<parallel>], iteration_bounds = array<i64: 1>, scalar_prefetch = 0 : i64, scratch_operands = 0 : i64, tpu.core_type = #tpu.core_type<tc>, window_params = [{transform_indices = @transform_0, window_bounds = array<i64: 8, 9>}, {pipeline_mode = #tpu.pipeline_mode<synchronous>, transform_indices = @transform_1, window_bounds = array<i64: 9, 256>}, {pipeline_mode = #tpu.pipeline_mode<synchronous>, transform_indices = @transform_2, window_bounds = array<i64: 1, 256>}, {pipeline_mode = #tpu.pipeline_mode<synchronous>, transform_indices = @transform_3, window_bounds = array<i64: 256, 256>}, {pipeline_mode = #tpu.pipeline_mode<synchronous>, transform_indices = @transform_4, window_bounds = array<i64: 1, 256>}, {pipeline_mode = #tpu.pipeline_mode<synchronous>, transform_indices = @transform_5, window_bounds = array<i64: 256, 9>}, {pipeline_mode = #tpu.pipeline_mode<synchronous>, transform_indices = @transform_6, window_bounds = array<i64: 1, 9>}, {transform_indices = @transform_7, window_bounds = array<i64: 8, 9>}]} {
    %c0 = arith.constant 0 : index
    %c0_0 = arith.constant 0 : index
    %0 = vector.load %arg1[%c0, %c0_0] : memref<8x9xf32, #tpu.memory_space<vmem>>, vector<8x9xf32>
    %c0_1 = arith.constant 0 : index
    %c0_2 = arith.constant 0 : index
    %1 = vector.load %arg2[%c0_1, %c0_2] : memref<9x256xf32, #tpu.memory_space<vmem>>, vector<9x256xf32>
    %cst = arith.constant dense<0.000000e+00> : vector<8x256xf32>
    %2 = tpu.matmul %0, %1, %cst {dimension_numbers = #tpu.dot_dimension_numbers<[1], [0], [0], [1], [0, 0, 1, 1], [], []>} : vector<8x9xf32>, vector<9x256xf32>, vector<8x256xf32> -> vector<8x256xf32>
    %c0_3 = arith.constant 0 : index
    %c0_4 = arith.constant 0 : index
    %3 = vector.load %arg3[%c0_3, %c0_4] : memref<1x256xf32, #tpu.memory_space<vmem>>, vector<1x256xf32>
    %4 = vector.broadcast %3 : vector<1x256xf32> to vector<8x256xf32>
    %5 = arith.addf %2, %4 : vector<8x256xf32>
    %cst_5 = arith.constant 0.000000e+00 : f32
    %6 = vector.broadcast %cst_5 : f32 to vector<8x256xf32>
    %7 = arith.maximumf %5, %6 : vector<8x256xf32>
    %c0_6 = arith.constant 0 : index
    %c0_7 = arith.constant 0 : index
    %8 = vector.load %arg4[%c0_6, %c0_7] : memref<256x256xf32, #tpu.memory_space<vmem>>, vector<256x256xf32>
    %cst_8 = arith.constant dense<0.000000e+00> : vector<8x256xf32>
    %9 = tpu.matmul %7, %8, %cst_8 {dimension_numbers = #tpu.dot_dimension_numbers<[1], [0], [0], [1], [0, 0, 1, 1], [], []>} : vector<8x256xf32>, vector<256x256xf32>, vector<8x256xf32> -> vector<8x256xf32>
    %c0_9 = arith.constant 0 : index
    %c0_10 = arith.constant 0 : index
    %10 = vector.load %arg5[%c0_9, %c0_10] : memref<1x256xf32, #tpu.memory_space<vmem>>, vector<1x256xf32>
    %11 = vector.broadcast %10 : vector<1x256xf32> to vector<8x256xf32>
    %12 = arith.addf %9, %11 : vector<8x256xf32>
    %cst_11 = arith.constant 0.000000e+00 : f32
    %13 = vector.broadcast %cst_11 : f32 to vector<8x256xf32>
    %14 = arith.maximumf %12, %13 : vector<8x256xf32>
    %c0_12 = arith.constant 0 : index
    %c0_13 = arith.constant 0 : index
    %15 = vector.load %arg6[%c0_12, %c0_13] : memref<256x9xf32, #tpu.memory_space<vmem>>, vector<256x9xf32>
    %cst_14 = arith.constant dense<0.000000e+00> : vector<8x9xf32>
    %16 = tpu.matmul %14, %15, %cst_14 {dimension_numbers = #tpu.dot_dimension_numbers<[1], [0], [0], [1], [0, 0, 1, 1], [], []>} : vector<8x256xf32>, vector<256x9xf32>, vector<8x9xf32> -> vector<8x9xf32>
    %c0_15 = arith.constant 0 : index
    %c0_16 = arith.constant 0 : index
    %17 = vector.load %arg7[%c0_15, %c0_16] : memref<1x9xf32, #tpu.memory_space<vmem>>, vector<1x9xf32>
    %18 = vector.broadcast %17 : vector<1x9xf32> to vector<8x9xf32>
    %19 = arith.addf %16, %18 : vector<8x9xf32>
    %c0_17 = arith.constant 0 : index
    %c0_18 = arith.constant 0 : index
    %20 = vector.load %arg8[%c0_17, %c0_18] : memref<8x9xf32, #tpu.memory_space<vmem>>, vector<8x9xf32>
    tpu.vector_store %arg8[%c0_17, %c0_18], %19 {strides = array<i32>} : memref<8x9xf32, #tpu.memory_space<vmem>>, vector<8x9xf32>,
    return
  }
  func.func @transform_0(%arg0: i32) -> (i32, i32) {
    %c0_i32 = arith.constant 0 : i32
    %c0_i32_0 = arith.constant 0 : i32
    return %arg0, %c0_i32 : i32, i32
  }
  func.func @transform_1(%arg0: i32) -> (i32, i32) {
    %c0_i32 = arith.constant 0 : i32
    %c0_i32_0 = arith.constant 0 : i32
    %c0_i32_1 = arith.constant 0 : i32
    return %c0_i32, %c0_i32_0 : i32, i32
  }
  func.func @transform_2(%arg0: i32) -> (i32, i32) {
    %c0_i32 = arith.constant 0 : i32
    %c0_i32_0 = arith.constant 0 : i32
    %c0_i32_1 = arith.constant 0 : i32
    return %c0_i32, %c0_i32_0 : i32, i32
  }
  func.func @transform_3(%arg0: i32) -> (i32, i32) {
    %c0_i32 = arith.constant 0 : i32
    %c0_i32_0 = arith.constant 0 : i32
    %c0_i32_1 = arith.constant 0 : i32
    return %c0_i32, %c0_i32_0 : i32, i32
  }
  func.func @transform_4(%arg0: i32) -> (i32, i32) {
    %c0_i32 = arith.constant 0 : i32
    %c0_i32_0 = arith.constant 0 : i32
    %c0_i32_1 = arith.constant 0 : i32
    return %c0_i32, %c0_i32_0 : i32, i32
  }
  func.func @transform_5(%arg0: i32) -> (i32, i32) {
    %c0_i32 = arith.constant 0 : i32
    %c0_i32_0 = arith.constant 0 : i32
    %c0_i32_1 = arith.constant 0 : i32
    return %c0_i32, %c0_i32_0 : i32, i32
  }
  func.func @transform_6(%arg0: i32) -> (i32, i32) {
    %c0_i32 = arith.constant 0 : i32
    %c0_i32_0 = arith.constant 0 : i32
    %c0_i32_1 = arith.constant 0 : i32
    return %c0_i32, %c0_i32_0 : i32, i32
  }
  func.func @transform_7(%arg0: i32) -> (i32, i32) {
    %c0_i32 = arith.constant 0 : i32
    %c0_i32_0 = arith.constant 0 : i32
    return %arg0, %c0_i32 : i32, i32
  }
}

</mosaic_0001>

<bundles_post_ra>
// kernel: qnetwork_forward.1
= control target key start
LH: loop header
LB: loop body
LE: loop exit
PB: predicated region body
PF: predicated region fallthrough
CT: control target
= control target key end

     0   :  { %12 = vsyncpa [#allocation3], 0  ;;  %s677_s0 = inlined_call_operand.vmem [shape: f32[8,9], index: 0, kind: input, shape index: {}]   ;;  %s678_s1 = inlined_call_operand.vmem [shape: f32[9,256], index: 1, kind: input, shape index: {}]   ;;  %s679_s2 = inlined_call_operand.vmem [shape: f32[1,256], index: 2, kind: input, shape index: {}]   ;;  %s680_s3 = inlined_call_operand.hbm [shape: f32[256,256], index: 3, kind: input, shape index: {}]   ;;  %s681_s4 = inlined_call_operand.vmem [shape: f32[1,256], index: 4, kind: input, shape index: {}]   ;;  %s682_s5 = inlined_call_operand.vmem [shape: f32[256,9], index: 5, kind: input, shape index: {}]   ;;  %s683_s6 = inlined_call_operand.vmem [shape: f32[1,9], index: 6, kind: input, shape index: {}]   ;;  %s684_s7 = inlined_call_operand.hbm [shape: f32[8,9], index: 7, kind: output, shape index: {}]  }
   0x1   :  { %13 = vsyncpa [#allocation4], 0  ;;  %s504_s24 = smov [#allocation2]  }
   0x2   :  { %s25_s25 = sshll.u32 %s504_s24, 4  ;;  %s26_s25 = int_to_ptr.vmem [resolvable:$true] %s25_s25 }
   0x3   :  { %s468_s26 = scalar_lea.vmem %s26_s25, 8192  ;;  %p473_p1 = scmp.lt.s32.totalorder %s26_s25, %s26_s25 }
   0x4   :  { %p469_p0 = scmp.ne.s32.totalorder %s26_s25, %s468_s26  ;;  %p474_p2 = scmp.lt.s32.totalorder %s468_s26, %s468_s26 }
   0x6   :  { %p475_p3 = por %p474_p2, %p473_p1 }
   0x8   :  { %p476_p4 = pnand %p475_p3, %p469_p0 }
   0xa   :  { %479 = shalt.err (!%p476_p4)
}
   0xb   :  { %s505_s27 = smov 256   ;;  %s506_s28 = smov 16  }
   0xc   :  { %31 = dma.hbm_to_vmem [thread:$0]  %s680_s3, 8192, %s26_s25, [#allocation3], %s505_s27, %s505_s27, %s506_s28  }
   0xd   :  { %500 = dma.done.wait [#allocation3], 8192  }
   0xe   :  { %501 = vsyncadd [#allocation3], 4294959104  ;;  %v507_v0 = vmov 0.0   ;;  %vm62_vm0 = vcmask 1040384   ;;  %v45_v1 = vld [vmem:[%s678_s1 + $0x18] sm:$0x1] }
   0xf   :  { %133 = vmatprep.mubr.f32.mxu0 %v507_v0  ;;  %v44_v2 = vld [vmem:[%s678_s1 + $0x10] sm:$0x1]  ;;  %v43_v3 = vld [vmem:[%s678_s1 + $0x8] sm:$0xff]  ;;  %416 = vmatprep.subr.msk.mxu0 %vm62_vm0, %v45_v1  ;;  %v42_v4 = vld [vmem:[%s678_s1] sm:$0xff]  ;;  %vm58_vm1 = vcmask 72704  }
  0x10   :  { %v41_v5 = vld [vmem:[%s677_s0] sm:$0xff]  ;;  %v173_v6 = vld [vmem:[#allocation2 + $0xf8] sm:$0xff]  ;;  %417 = vmatpush1.msk.msra.mxu0 %vm62_vm0, %v44_v2  ;;  %v172_v7 = vld [vmem:[#allocation2 + $0xf0] sm:$0xff] }
  0x11   :  { %218 = vmatprep.subr.mxu1 %v173_v6  ;;  %v171_v8 = vld [vmem:[#allocation2 + $0xe8] sm:$0xff]  ;;  %v170_v9 = vld [vmem:[#allocation2 + $0xe0] sm:$0xff]  ;;  %99 = vmatprep.subr.mxu0 %v43_v3  ;;  %v169_v10 = vld [vmem:[#allocation2 + $0xd8] sm:$0xff] }
  0x12   :  { %219 = vmatpush1.msra.mxu1 %v172_v7  ;;  %100 = vmatpush1.msra.mxu0 %v42_v4  ;;  %v168_v11 = vld [vmem:[#allocation2 + $0xd0] sm:$0xff]  ;;  %v167_v12 = vld [vmem:[#allocation2 + $0xc8] sm:$0xff]  ;;  %v166_v13 = vld [vmem:[#allocation2 + $0xc0] sm:$0xff] }
  0x13   :  { %220 = vmatprep.subr.mxu1 %v171_v8  ;;  %418 = vmatmul.mubr.msk.f32.vlgmr.msra.gmra.mxu0 %vm58_vm1, %v41_v5  ;;  %v165_v14 = vld [vmem:[#allocation2 + $0xb8] sm:$0xff]  ;;  %v164_v15 = vld [vmem:[#allocation2 + $0xb0] sm:$0xff]  ;;  %v163_v16 = vld [vmem:[#allocation2 + $0xa8] sm:$0xff] }
  0x14   :  { %221 = vmatpush1.msra.mxu1 %v170_v9  ;;  %v162_v17 = vld [vmem:[#allocation2 + $0xa0] sm:$0xff]  ;;  %v161_v18 = vld [vmem:[#allocation2 + $0x98] sm:$0xff]  ;;  %v160_v19 = vld [vmem:[#allocation2 + $0x90] sm:$0xff] }
  0x15   :  { %222 = vmatprep.subr.mxu1 %v169_v10  ;;  %v159_v20 = vld [vmem:[#allocation2 + $0x88] sm:$0xff]  ;;  %v158_v21 = vld [vmem:[#allocation2 + $0x80] sm:$0xff]  ;;  %v157_v22 = vld [vmem:[#allocation2 + $0x78] sm:$0xff] }
  0x16   :  { %223 = vmatpush1.msra.mxu1 %v168_v11  ;;  %v156_v23 = vld [vmem:[#allocation2 + $0x70] sm:$0xff]  ;;  %v155_v24 = vld [vmem:[#allocation2 + $0x68] sm:$0xff]  ;;  %v154_v25 = vld [vmem:[#allocation2 + $0x60] sm:$0xff] }
  0x17   :  { %224 = vmatprep.subr.mxu1 %v167_v12  ;;  %v153_v26 = vld [vmem:[#allocation2 + $0x58] sm:$0xff]  ;;  %v152_v27 = vld [vmem:[#allocation2 + $0x50] sm:$0xff]  ;;  %v151_v28 = vld [vmem:[#allocation2 + $0x48] sm:$0xff] }
  0x18   :  { %225 = vmatpush1.msra.mxu1 %v166_v13  ;;  %v150_v29 = vld [vmem:[#allocation2 + $0x40] sm:$0xff]  ;;  %v149_v30 = vld [vmem:[#allocation2 + $0x38] sm:$0xff]  ;;  %v148_v31 = vld [vmem:[#allocation2 + $0x30] sm:$0xff] }
  0x19   :  { %226 = vmatprep.subr.mxu1 %v165_v14  ;;  %v147_v32 = vld [vmem:[#allocation2 + $0x28] sm:$0xff]  ;;  %v146_v33 = vld [vmem:[#allocation2 + $0x20] sm:$0xff]  ;;  %v145_v34 = vld [vmem:[#allocation2 + $0x18] sm:$0xff] }
  0x1a   :  { %227 = vmatpush1.msra.mxu1 %v164_v15  ;;  %v144_v35 = vld [vmem:[#allocation2 + $0x10] sm:$0xff]  ;;  %v143_v36 = vld [vmem:[#allocation2 + $0x8] sm:$0xff]  ;;  %v142_v37 = vld [vmem:[#allocation2] sm:$0xff] }
  0x1b   :  { %228 = vmatprep.subr.mxu1 %v163_v16  ;;  %v205_v38 = vld [vmem:[#allocation2 + $0x1f8] sm:$0xff]  ;;  %v204_v39 = vld [vmem:[#allocation2 + $0x1f0] sm:$0xff]  ;;  %v203_v40 = vld [vmem:[#allocation2 + $0x1e8] sm:$0xff] }
  0x1c   :  { %229 = vmatpush1.msra.mxu1 %v162_v17  ;;  %v202_v41 = vld [vmem:[#allocation2 + $0x1e0] sm:$0xff]  ;;  %v201_v42 = vld [vmem:[#allocation2 + $0x1d8] sm:$0xff]  ;;  %v200_v43 = vld [vmem:[#allocation2 + $0x1d0] sm:$0xff] }
  0x1d   :  { %230 = vmatprep.subr.mxu1 %v161_v18  ;;  %v199_v44 = vld [vmem:[#allocation2 + $0x1c8] sm:$0xff]  ;;  %v198_v45 = vld [vmem:[#allocation2 + $0x1c0] sm:$0xff]  ;;  %v197_v46 = vld [vmem:[#allocation2 + $0x1b8] sm:$0xff] }
  0x1e   :  { %231 = vmatpush1.msra.mxu1 %v160_v19  ;;  %v196_v47 = vld [vmem:[#allocation2 + $0x1b0] sm:$0xff]  ;;  %v195_v48 = vld [vmem:[#allocation2 + $0x1a8] sm:$0xff]  ;;  %v194_v49 = vld [vmem:[#allocation2 + $0x1a0] sm:$0xff] }
  0x1f   :  { %232 = vmatprep.subr.mxu1 %v159_v20  ;;  %v193_v50 = vld [vmem:[#allocation2 + $0x198] sm:$0xff]  ;;  %v192_v51 = vld [vmem:[#allocation2 + $0x190] sm:$0xff]  ;;  %v191_v52 = vld [vmem:[#allocation2 + $0x188] sm:$0xff] }
  0x20   :  { %233 = vmatpush1.msra.mxu1 %v158_v21  ;;  %v190_v53 = vld [vmem:[#allocation2 + $0x180] sm:$0xff]  ;;  %v189_v54 = vld [vmem:[#allocation2 + $0x178] sm:$0xff]  ;;  %v188_v55 = vld [vmem:[#allocation2 + $0x170] sm:$0xff] }
  0x21   :  { %234 = vmatprep.subr.mxu1 %v157_v22  ;;  %v187_v56 = vld [vmem:[#allocation2 + $0x168] sm:$0xff]  ;;  %v186_v57 = vld [vmem:[#allocation2 + $0x160] sm:$0xff]  ;;  %v185_v58 = vld [vmem:[#allocation2 + $0x158] sm:$0xff] }
  0x22   :  { %235 = vmatpush1.msra.mxu1 %v156_v23  ;;  %v184_v59 = vld [vmem:[#allocation2 + $0x150] sm:$0xff]  ;;  %v183_v60 = vld [vmem:[#allocation2 + $0x148] sm:$0xff]  ;;  %v182_v61 = vld [vmem:[#allocation2 + $0x140] sm:$0xff] }
  0x23   :  { %236 = vmatprep.subr.mxu1 %v155_v24  ;;  %v181_v62 = vld [vmem:[#allocation2 + $0x138] sm:$0xff]  ;;  %v180_v63 = vld [vmem:[#allocation2 + $0x130] sm:$0xff]  ;;  %v179_v0 = vld [vmem:[#allocation2 + $0x128] sm:$0xff] }
  0x24   :  { %237 = vmatpush1.msra.mxu1 %v154_v25  ;;  %v178_v1 = vld [vmem:[#allocation2 + $0x120] sm:$0xff]  ;;  %v177_v2 = vld [vmem:[#allocation2 + $0x118] sm:$0xff]  ;;  %v176_v3 = vld [vmem:[#allocation2 + $0x110] sm:$0xff] }
  0x25   :  { %238 = vmatprep.subr.mxu1 %v153_v26  ;;  %v175_v4 = vld [vmem:[#allocation2 + $0x108] sm:$0xff]  ;;  %v174_v5 = vld [vmem:[#allocation2 + $0x100] sm:$0xff]  ;;  %v322_v6 = vld [vmem:[%s682_s5 + $0xf8] sm:$0xff] }
  0x26   :  { %239 = vmatpush1.msra.mxu1 %v152_v27  ;;  %v306_v7 = vld [vmem:[%s682_s5 + $0x78] sm:$0xff]  ;;  %v321_v8 = vld [vmem:[%s682_s5 + $0xf0] sm:$0xff]  ;;  %420 = vmatprep.subr.mxu0 %v322_v6  ;;  %v320_v10 = vld [vmem:[%s682_s5 + $0xe8] sm:$0xff] }
  0x27   :  { %240 = vmatprep.subr.mxu1 %v151_v28  ;;  %v305_v9 = vld [vmem:[%s682_s5 + $0x70] sm:$0xff]  ;;  %421 = vmatpush3.msra.mxu0 %v306_v7  ;;  %v304_v11 = vld [vmem:[%s682_s5 + $0x68] sm:$0xff]  ;;  %v319_v12 = vld [vmem:[%s682_s5 + $0xe0] sm:$0xff] }
  0x28   :  { %241 = vmatpush1.msra.mxu1 %v150_v29  ;;  %422 = vmatprep.subr.mxu0 %v321_v8  ;;  %v303_v13 = vld [vmem:[%s682_s5 + $0x60] sm:$0xff]  ;;  %v318_v14 = vld [vmem:[%s682_s5 + $0xd8] sm:$0xff]  ;;  %v317_v16 = vld [vmem:[%s682_s5 + $0xd0] sm:$0xff] }
  0x29   :  { %242 = vmatprep.subr.mxu1 %v149_v30  ;;  %423 = vmatpush3.msra.mxu0 %v305_v9  ;;  %v302_v15 = vld [vmem:[%s682_s5 + $0x58] sm:$0xff]  ;;  %v301_v17 = vld [vmem:[%s682_s5 + $0x50] sm:$0xff]  ;;  %v316_v18 = vld [vmem:[%s682_s5 + $0xc8] sm:$0xff]  ;;  %v48_v30 = vlaneseq }
  0x2a   :  { %243 = vmatpush1.msra.mxu1 %v148_v31  ;;  %424 = vmatprep.subr.mxu0 %v320_v10  ;;  %v300_v19 = vld [vmem:[%s682_s5 + $0x48] sm:$0xff]  ;;  %v315_v20 = vld [vmem:[%s682_s5 + $0xc0] sm:$0xff]  ;;  %v314_v22 = vld [vmem:[%s682_s5 + $0xb8] sm:$0xff] }
  0x2b   :  { %244 = vmatprep.subr.mxu1 %v147_v32  ;;  %425 = vmatpush3.msra.mxu0 %v304_v11  ;;  %v299_v21 = vld [vmem:[%s682_s5 + $0x40] sm:$0xff]  ;;  %v298_v23 = vld [vmem:[%s682_s5 + $0x38] sm:$0xff]  ;;  %v313_v24 = vld [vmem:[%s682_s5 + $0xb0] sm:$0xff]  ;;  %v49_v31 = vshrl.u32 %v48_v30, 7 }
  0x2c   :  { %245 = vmatpush1.msra.mxu1 %v146_v33  ;;  %426 = vmatprep.subr.mxu0 %v319_v12  ;;  %v297_v25 = vld [vmem:[%s682_s5 + $0x30] sm:$0xff]  ;;  %v312_v26 = vld [vmem:[%s682_s5 + $0xa8] sm:$0xff]  ;;  %v311_v28 = vld [vmem:[%s682_s5 + $0xa0] sm:$0xff] }
  0x2d   :  { %246 = vmatprep.subr.mxu1 %v145_v34  ;;  %427 = vmatpush3.msra.mxu0 %v303_v13  ;;  %v296_v27 = vld [vmem:[%s682_s5 + $0x28] sm:$0xff]  ;;  %v295_v29 = vld [vmem:[%s682_s5 + $0x20] sm:$0xff]  ;;  %v50_v32 = vsub.s32 0, %v49_v31  ;;  %v54_v34 = vsub.s32 1, %v49_v31 }
  0x2e   :  { %247 = vmatpush1.msra.mxu1 %v144_v35  ;;  %428 = vmatprep.subr.mxu0 %v318_v14  ;;  %v46_v33 = vld [vmem:[%s679_s2] sm:$0x3] }
  0x2f   :  { %248 = vmatprep.subr.mxu1 %v143_v36  ;;  %429 = vmatpush3.msra.mxu0 %v302_v15  ;;  %v51_v35 = vrot.slane %v46_v33, %v50_v32  ;;  %v55_v36 = vrot.slane %v46_v33, %v54_v34 }
  0x30   :  { %249 = vmatpush1.msra.mxu1 %v142_v37  ;;  %430 = vmatprep.subr.mxu0 %v317_v16 }
  0x31   :  { %250 = vmatprep.subr.mxu1 %v205_v38  ;;  %431 = vmatpush3.msra.mxu0 %v301_v17 }
  0x32   :  { %251 = vmatpush2.msra.mxu1 %v204_v39  ;;  %432 = vmatprep.subr.mxu0 %v316_v18 }
  0x33   :  { %252 = vmatprep.subr.mxu1 %v203_v40  ;;  %433 = vmatpush3.msra.mxu0 %v300_v19 }
  0x34   :  { %253 = vmatpush2.msra.mxu1 %v202_v41  ;;  %434 = vmatprep.subr.mxu0 %v315_v20 }
  0x35   :  { %254 = vmatprep.subr.mxu1 %v201_v42  ;;  %435 = vmatpush3.msra.mxu0 %v299_v21 }
  0x36   :  { %255 = vmatpush2.msra.mxu1 %v200_v43  ;;  %436 = vmatprep.subr.mxu0 %v314_v22  ;;  %v310_v43 = vld [vmem:[%s682_s5 + $0x98] sm:$0xff] }
  0x37   :  { %256 = vmatprep.subr.mxu1 %v199_v44  ;;  %437 = vmatpush3.msra.mxu0 %v298_v23  ;;  %v294_v44 = vld [vmem:[%s682_s5 + $0x18] sm:$0xff] }
  0x38   :  { %257 = vmatpush2.msra.mxu1 %v198_v45  ;;  %438 = vmatprep.subr.mxu0 %v313_v24  ;;  %v309_v45 = vld [vmem:[%s682_s5 + $0x90] sm:$0xff] }
  0x39   :  { %258 = vmatprep.subr.mxu1 %v197_v46  ;;  %439 = vmatpush3.msra.mxu0 %v297_v25  ;;  %v293_v46 = vld [vmem:[%s682_s5 + $0x10] sm:$0xff] }
  0x3a   :  { %259 = vmatpush2.msra.mxu1 %v196_v47  ;;  %440 = vmatprep.subr.mxu0 %v312_v26  ;;  %v308_v47 = vld [vmem:[%s682_s5 + $0x88] sm:$0xff] }
  0x3b   :  { %260 = vmatprep.subr.mxu1 %v195_v48  ;;  %441 = vmatpush3.msra.mxu0 %v296_v27  ;;  %v292_v48 = vld [vmem:[%s682_s5 + $0x8] sm:$0xff] }
  0x3c   :  { %261 = vmatpush2.msra.mxu1 %v194_v49  ;;  %442 = vmatprep.subr.mxu0 %v311_v28  ;;  %v307_v49 = vld [vmem:[%s682_s5 + $0x80] sm:$0xff] }
  0x3d   :  { %262 = vmatprep.subr.mxu1 %v193_v50  ;;  %443 = vmatpush3.msra.mxu0 %v295_v29  ;;  %v291_v50 = vld [vmem:[%s682_s5] sm:$0xff]  ;;  %s508_s5 = smov [#allocation5]  }
  0x3e   :  { %263 = vmatpush2.msra.mxu1 %v192_v51  ;;  %444 = vmatprep.subr.mxu0 %v310_v43  ;;  %v206_v51 = vld [vmem:[%s681_s4] sm:$0x3]  ;;  %s407_s9 = sshll.u32 %s508_s5, 4  ;;  %s408_s9 = int_to_ptr.vmem [resolvable:$true] %s407_s9 }
  0x3f   :  { %264 = vmatprep.subr.mxu1 %v191_v52  ;;  %445 = vmatpush3.msra.mxu0 %v294_v44  ;;  %v211_v52 = vrot.slane %v206_v51, %v50_v32  ;;  %s480_s4 = scalar_lea.vmem %s408_s9, 128  ;;  %p485_p6 = scmp.lt.s32.totalorder %s408_s9, %s408_s9 }
  0x40   :  { %265 = vmatpush2.msra.mxu1 %v190_v53  ;;  %446 = vmatprep.subr.mxu0 %v309_v45  ;;  %v215_v53 = vrot.slane %v206_v51, %v54_v34  ;;  %p481_p5 = scmp.ne.s32.totalorder %s408_s9, %s480_s4  ;;  %p486_p7 = scmp.lt.s32.totalorder %s480_s4, %s480_s4 }
  0x41   :  { %266 = vmatprep.subr.mxu1 %v189_v54  ;;  %447 = vmatpush3.msra.mxu0 %v293_v46 }
  0x42   :  { %267 = vmatpush2.msra.mxu1 %v188_v55  ;;  %448 = vmatprep.subr.mxu0 %v308_v47  ;;  %p487_p8 = por %p486_p7, %p485_p6 }
  0x43   :  { %268 = vmatprep.subr.mxu1 %v187_v56  ;;  %449 = vmatpush3.msra.mxu0 %v292_v48 }
  0x44   :  { %269 = vmatpush2.msra.mxu1 %v186_v57  ;;  %450 = vmatprep.subr.mxu0 %v307_v49  ;;  %p488_p9 = pnand %p487_p8, %p481_p5 }
  0x45   :  { %270 = vmatprep.subr.mxu1 %v185_v58  ;;  %451 = vmatpush3.msra.mxu0 %v291_v50 }
  0x46   :  { %271 = vmatpush2.msra.mxu1 %v184_v59 }
  0x47   :  { %272 = vmatprep.subr.mxu1 %v183_v60 }
  0x48   :  { %273 = vmatpush2.msra.mxu1 %v182_v61  ;;  %v419_v61 = vld [vmem:[%s683_s6] ss:$0 sm:$0xff] }
  0x49   :  { %274 = vmatprep.subr.mxu1 %v181_v62 }
  0x4a   :  { %275 = vmatpush2.msra.mxu1 %v180_v63 }
  0x4b   :  { %276 = vmatprep.subr.mxu1 %v179_v0 }
  0x4c   :  { %277 = vmatpush2.msra.mxu1 %v178_v1 }
  0x4d   :  { %278 = vmatprep.subr.mxu1 %v177_v2 }
  0x4e   :  { %279 = vmatpush2.msra.mxu1 %v176_v3 }
  0x4f   :  { %280 = vmatprep.subr.mxu1 %v175_v4 }
  0x50   :  { %281 = vmatpush2.msra.mxu1 %v174_v5 }
  0xd3   :  { %v135_v37 = vpop.f32.mrf.mxu0 }
  0xd4   :  { %v136_v38 = vadd.f32 %v135_v37, %v51_v35 }
  0xd5   :  { %v137_v39 = vpop.f32.mrf.mxu0 }
  0xd6   :  { %v138_v40 = vadd.f32 %v137_v39, %v55_v36  ;;  %v140_v42 = vmax.f32 %v136_v38, 0.0 }
  0xd8   :  { %v141_v41 = vmax.f32 %v138_v40, 0.0 }
  0xda   :  { %282 = vmatprep.mubr.f32.mxu1 %v141_v41 }
  0xdb   :  { %283 = vmatmul.mubr.f32.vlgmr.msra.gmra.mxu1 %v140_v42 }
 0x19b   :  { %v284_v54 = vpop.f32.mrf.mxu1 }
 0x19c   :  { %v285_v55 = vadd.f32 %v284_v54, %v211_v52 }
 0x19d   :  { %v286_v56 = vpop.f32.mrf.mxu1 }
 0x19e   :  { %v287_v57 = vadd.f32 %v286_v56, %v215_v53  ;;  %v289_v59 = vmax.f32 %v285_v55, 0.0 }
 0x1a0   :  { %v290_v58 = vmax.f32 %v287_v57, 0.0 }
 0x1a2   :  { %394 = vmatprep.mubr.f32.mxu0 %v290_v58 }
 0x1a3   :  { %395 = vmatmul.mubr.f32.vlgmr.msra.gmra.mxu0 %v289_v59 }
 0x263   :  { %v452_v60 = vpop.f32.mrf.mxu0 }
 0x265   :  { %v453_v62 = vpop.f32.mrf.mxu0 }
 0x266   :  { %v454_v63 = vadd.f32 %v453_v62, %v452_v60 }
 0x268   :  { %v397_v0 = vadd.f32 %v454_v63, %v419_v61 }
 0x26a   :  { %400 = vst.msk [vmem:[#allocation5] sm:$0xff] %vm58_vm1, %v397_v0 }
 0x26b   :  { %491 = shalt.err (!%p488_p9)
}
 0x26c   :  { %410 = dma.vmem_to_hbm [thread:$0]  %s408_s9, 128, %s684_s7, [#allocation4]  }
 0x26d   :  { %502 = dma.done.wait [#allocation4], 128  }
 0x26e   :  { %503 = vsyncadd [#allocation4], 4294967168 }
 0x26f   :  { %414 = vsyncpa [#allocation3], 1 }
 0x270   :  { %415 = vsyncpa [#allocation4], 1 }

</bundles_post_ra>
